<compile_context>
chip_gen: v6e
topology: v6e:2x2x1
jax: 0.10.0
libtpu: 0.0.40
codegen_flags: <defaults>
</compile_context>

<pallas_src>
import math

import jax
import jax.numpy as jnp
from jax.experimental import pallas as pl
from jax.experimental.pallas import tpu as pltpu


# --------------------------------------------------------------------------
# Kernels
# --------------------------------------------------------------------------
def _resblock_kernel_resident(x_mm_ref, w_ref, b_ref, x_res_ref, o_ref):
    # Full-K matmul against a weight panel that stays resident across the M
    # sweep (its block index does not depend on the inner grid axis).
    h = jnp.dot(x_mm_ref[...], w_ref[...], preferred_element_type=jnp.float32)
    h = h + b_ref[...].astype(jnp.float32)
    res = x_res_ref[...].astype(jnp.float32)
    o_ref[...] = (res + h * jax.nn.sigmoid(h)).astype(o_ref.dtype)


def _resblock_kernel_ktiled(x_mm_ref, w_ref, b_ref, x_res_ref, o_ref, acc_ref):
    k = pl.program_id(2)
    partial = jnp.dot(x_mm_ref[...], w_ref[...],
                      preferred_element_type=jnp.float32)

    @pl.when(k == 0)
    def _store():                       # first K step: store (no zero-then-add)
        acc_ref[...] = partial

    @pl.when(k > 0)
    def _accumulate():
        acc_ref[...] += partial

    @pl.when(k == pl.num_programs(2) - 1)
    def _finalize():                    # fused bias + SiLU + residual epilogue
        h = acc_ref[...] + b_ref[...].astype(jnp.float32)
        res = x_res_ref[...].astype(jnp.float32)
        o_ref[...] = (res + h * jax.nn.sigmoid(h)).astype(o_ref.dtype)


# --------------------------------------------------------------------------
# Tiling helpers
# --------------------------------------------------------------------------
def _round_up(x, m):
    return ((x + m - 1) // m) * m


def _pick_tile(dim, preferred, align):
    """Largest multiple of `align` <= `preferred` that divides `dim`."""
    if dim <= preferred:
        return dim
    t = (preferred // align) * align
    while t >= align:
        if dim % t == 0:
            return t
        t -= align
    return dim


def _tile_candidates(dim, align, max_pref):
    """Descending list of tile sizes (multiples of align) that divide `dim`."""
    cands = []
    p = max_pref
    while p >= align:
        t = _pick_tile(dim, p, align)
        if t not in cands:
            cands.append(t)
        p //= 2
    return cands


def _vmem_capacity():
    try:
        return int(pltpu.get_tpu_info().vmem_capacity_bytes)
    except Exception:
        return 64 * 1024 * 1024          # conservative (v7x-sized) fallback


# --------------------------------------------------------------------------
# Wrapper
# --------------------------------------------------------------------------
def resblock(x, w_t, bias, *, compute_dtype=None, force_path=None):
    """Fused y = x + SiLU(x @ w_t + bias).

    x:    [M, H]   activations (hidden on the lane axis).
    w_t:  [H, H]   weight pre-transposed ONCE at setup ([out,in] -> [in,out]).
    bias: [H]
    compute_dtype: optional MXU operand dtype (e.g. jnp.bfloat16 on v5e);
      accumulation stays f32 and the residual keeps x's dtype.
    force_path: None (auto) | "resident" | "ktiled".
    """
    if force_path not in (None, "resident", "ktiled"):
        raise ValueError(f"unknown force_path={force_path!r}")

    M, H = x.shape
    assert w_t.shape == (H, H) and bias.shape == (H,)

    out_dtype = x.dtype
    xc = x if compute_dtype is None else x.astype(compute_dtype)

    x_is = jnp.dtype(out_dtype).itemsize
    xc_is = jnp.dtype(xc.dtype).itemsize
    w_dtype = w_t.dtype if compute_dtype is None else jnp.dtype(compute_dtype)
    w_is = jnp.dtype(w_dtype).itemsize
    b_is = jnp.dtype(bias.dtype).itemsize

    # dtype-aware sublane alignment for the M (sublane) axis.
    align_m = {4: 8, 2: 16, 1: 32}.get(xc_is, 8)
    M_pad = _round_up(M, align_m)
    H_pad = _round_up(H, 128)            # lane-dense hidden axis

    cap = _vmem_capacity()
    budget = int((cap - 16 * 1024 * 1024) * 0.9)   # headroom for Mosaic scratch

    tm_cands = _tile_candidates(M_pad, align_m, 1024)
    tn_cands = _tile_candidates(H_pad, 128, 1024)
    tk_cands = _tile_candidates(H_pad, 128, 512)   # small tk frees VMEM for tm/tn

    # ---- resident-W-panel plan: W read once, x re-read H/tn times ----------
    def res_bytes(tm, tn):
        return (2 * tm * H_pad * xc_is      # x matmul block (double-buffered)
                + 2 * H_pad * tn * w_is     # resident weight panel
                + 2 * tn * b_is             # bias
                + 2 * tm * tn * x_is        # residual x block
                + 2 * tm * tn * x_is)       # output block

    res_plan = None
    for tn in tn_cands:                     # big tn first: fewer x re-reads
        for tm in tm_cands:
            if res_bytes(tm, tn) <= budget:
                res_plan = (tm, tn)
                break
        if res_plan is not None:
            break

    # ---- K-tiled plan: minimize HBM traffic over (tm, tn), largest tk fitting
    def kt_bytes(tm, tn, tk, res_bufs):
        return (2 * tm * tk * xc_is
                + 2 * tk * tn * w_is
                + 2 * tn * b_is
                + res_bufs * tm * tn * x_is     # residual x block
                + 2 * tm * tn * x_is            # output block
                + tm * tn * 4)                  # f32 accumulator scratch

    kt_plan = None      # (traffic, tm, tn, tk, single_buffer_residual)
    for tm in tm_cands:
        for tn in tn_cands:
            picked = None
            for tk in tk_cands:
                if kt_bytes(tm, tn, tk, 2) <= budget:
                    picked = (tk, False)
                    break
                if kt_bytes(tm, tn, tk, 1) <= budget:   # Buffered(1) rescue
                    picked = (tk, True)
                    break
            if picked is None:
                continue
            tk, single = picked
            traffic = ((M_pad // tm) * H_pad * H_pad * w_is      # W re-streamed
                       + (H_pad // tn) * M_pad * H_pad * xc_is   # x re-streamed
                       + 2 * M_pad * H_pad * x_is)               # residual + out
            if kt_plan is None or traffic < kt_plan[0]:
                kt_plan = (traffic, tm, tn, tk, single)

    res_traffic = None
    if res_plan is not None:
        _, tn_r = res_plan
        res_traffic = (H_pad * H_pad * w_is
                       + (H_pad // tn_r) * M_pad * H_pad * xc_is
                       + 2 * M_pad * H_pad * x_is)

    if force_path == "resident":
        use_resident = True
    elif force_path == "ktiled":
        use_resident = False
    else:
        use_resident = (res_plan is not None
                        and (kt_plan is None or res_traffic <= kt_plan[0]))
    if use_resident and res_plan is None:
        raise ValueError("resident path requested but tiles do not fit VMEM")
    if not use_resident and kt_plan is None:
        raise ValueError("no K-tiled tiling fits the VMEM budget")

    # ---- pad to the padded problem size (zero padding is exact for this op) -
    def pad2(a, rows, cols):
        if a.shape == (rows, cols):
            return a
        return jnp.pad(a, ((0, rows - a.shape[0]), (0, cols - a.shape[1])))

    x_res_p = pad2(x, M_pad, H_pad)
    x_mm_p = x_res_p if compute_dtype is None else pad2(xc, M_pad, H_pad)
    w_p = pad2(w_t if compute_dtype is None else w_t.astype(compute_dtype),
               H_pad, H_pad)
    b_p = pad2(bias.reshape(1, H), 1, H_pad)

    def keep_two_parallel_tiles(tm, tn):
        # Ensure >=2 tiles on the parallel axes so both v7x TensorCores work.
        if (M_pad // tm) * (H_pad // tn) < 2:
            if tm % (2 * align_m) == 0:
                tm //= 2
            elif tn % 256 == 0:
                tn //= 2
        return tm, tn

    if use_resident:
        tm, tn = res_plan
        tm, tn = keep_two_parallel_tiles(tm, tn)
        grid = (H_pad // tn, M_pad // tm)        # M innermost -> W panel resident
        est = res_bytes(tm, tn)
        kernel = _resblock_kernel_resident
        in_specs = [
            pl.BlockSpec((tm, H_pad), lambda j, i: (i, 0)),    # x for matmul
            pl.BlockSpec((H_pad, tn), lambda j, i: (0, j)),    # resident W panel
            pl.BlockSpec((1, tn), lambda j, i: (0, j)),        # bias
            pl.BlockSpec((tm, tn), lambda j, i: (i, j)),       # x for residual
        ]
        out_spec = pl.BlockSpec((tm, tn), lambda j, i: (i, j))
        scratch = []
        dims = ("parallel", "parallel")
    else:
        _, tm, tn, tk, single_res = kt_plan
        tm, tn = keep_two_parallel_tiles(tm, tn)
        grid = (M_pad // tm, H_pad // tn, H_pad // tk)
        est = kt_bytes(tm, tn, tk, 1 if single_res else 2)
        kernel = _resblock_kernel_ktiled
        # Residual/bias blocks are constant along K; single-buffer them only
        # when VMEM is tight (v7x-style 64 MiB budgets).
        const_kw = ({"pipeline_mode": pl.Buffered(1)} if single_res else {})
        in_specs = [
            pl.BlockSpec((tm, tk), lambda i, j, k: (i, k)),            # x (matmul)
            pl.BlockSpec((tk, tn), lambda i, j, k: (k, j)),            # W^T tile
            pl.BlockSpec((1, tn), lambda i, j, k: (0, j), **const_kw),  # bias
            pl.BlockSpec((tm, tn), lambda i, j, k: (i, j), **const_kw),  # residual
        ]
        out_spec = pl.BlockSpec((tm, tn), lambda i, j, k: (i, j))
        scratch = [pltpu.VMEM((tm, tn), jnp.float32)]
        dims = ("parallel", "parallel", "arbitrary")

    # Scoped-VMEM limit: only raise it when needed, and clamp against the
    # physical capacity minus headroom (fixes uncapped est*1.5 on v7x).
    vmem_limit = None
    if est > 12 * 1024 * 1024:
        vmem_limit = min(int(est * 1.5) + (2 << 20), cap - (16 << 20))

    out = pl.pallas_call(
        kernel,
        out_shape=jax.ShapeDtypeStruct((M_pad, H_pad), out_dtype),
        grid_spec=pltpu.PrefetchScalarGridSpec(
            num_scalar_prefetch=0,
            grid=grid,
            in_specs=in_specs,
            out_specs=out_spec,
            scratch_shapes=scratch,
        ),
        compiler_params=pltpu.CompilerParams(
            dimension_semantics=dims,
            vmem_limit_bytes=vmem_limit,
        ),
    )(x_mm_p, w_p, b_p, x_res_p)

    if (M_pad, H_pad) != (M, H):
        out = out[:M, :H]
    return out


# --------------------------------------------------------------------------
# Demo / self-test
# --------------------------------------------------------------------------
if __name__ == "__main__":
    batch, seq, hidden = 2, 8, 32
    key = jax.random.PRNGKey(0)
    kx, kb, kw = jax.random.split(key, 3)

    # ResBlock.__init__: weight zero-init, bias ~ U(-1/sqrt(H), 1/sqrt(H)).
    weight = jnp.zeros((hidden, hidden), jnp.float32)            # [out, in]
    bound = 1.0 / math.sqrt(hidden)
    bias = jax.random.uniform(kb, (hidden,), jnp.float32, -bound, bound)
    w_t = jnp.asarray(weight.T)              # pre-transposed ONCE at setup

    x = jax.random.normal(kx, (batch, seq, hidden), jnp.float32)
    x2d = x.reshape(batch * seq, hidden)

    def ref_fn(xv, w, b):
        h = xv @ w.T + b
        return xv + h * jax.nn.sigmoid(h)

    # 1) Module-faithful run (zero-init weight), auto path selection.
    out = resblock(x2d, w_t, bias).reshape(batch, seq, hidden)
    jax.block_until_ready(out)
    assert jnp.allclose(out, ref_fn(x, weight, bias), atol=1e-5, rtol=1e-5), \
        "mismatch vs reference (zero-init weight)"

    # 2) Nonzero weight so the MXU/accumulator path is actually exercised;
    #    force the K-tiled kernel so both variants are compile-tested.
    weight_nz = jax.random.normal(kw, (hidden, hidden), jnp.float32) * 0.05
    w_t_nz = jnp.asarray(weight_nz.T)
    out_kt = resblock(x2d, w_t_nz, bias,
                      force_path="ktiled").reshape(batch, seq, hidden)
    jax.block_until_ready(out_kt)
    assert jnp.allclose(out_kt, ref_fn(x, weight_nz, bias), atol=1e-4, rtol=1e-4), \
        "mismatch vs reference (K-tiled, nonzero weight)"

    # 3) Same check through the resident-weight kernel.
    out_res = resblock(x2d, w_t_nz, bias,
                       force_path="resident").reshape(batch, seq, hidden)
    jax.block_until_ready(out_res)
    assert jnp.allclose(out_res, ref_fn(x, weight_nz, bias), atol=1e-4, rtol=1e-4), \
        "mismatch vs reference (resident, nonzero weight)"

    print("KERNEL_OK")
</pallas_src>

<mosaic_0001>
module attributes {stable_mosaic.version = 11 : i64} {
  func.func @_resblock_kernel_resident(%arg0: i32, %arg1: i32, %arg2: memref<8x128xf32, #tpu.memory_space<vmem>>, %arg3: memref<128x128xf32, #tpu.memory_space<vmem>>, %arg4: memref<1x128xf32, #tpu.memory_space<vmem>>, %arg5: memref<8x128xf32, #tpu.memory_space<vmem>>, %arg6: memref<8x128xf32, #tpu.memory_space<vmem>>) attributes {dimension_semantics = [#tpu.dimension_semantics<parallel>, #tpu.dimension_semantics<parallel>], iteration_bounds = array<i64: 1, 2>, scalar_prefetch = 0 : i64, scratch_operands = 0 : i64, tpu.core_type = #tpu.core_type<tc>, window_params = [{transform_indices = @transform_0, window_bounds = array<i64: 8, 128>}, {transform_indices = @transform_1, window_bounds = array<i64: 128, 128>}, {transform_indices = @transform_2, window_bounds = array<i64: 1, 128>}, {transform_indices = @transform_3, window_bounds = array<i64: 8, 128>}, {transform_indices = @transform_4, window_bounds = array<i64: 8, 128>}]} {
    %c0 = arith.constant 0 : index
    %c0_0 = arith.constant 0 : index
    %0 = vector.load %arg2[%c0, %c0_0] : memref<8x128xf32, #tpu.memory_space<vmem>>, vector<8x128xf32>
    %c0_1 = arith.constant 0 : index
    %c0_2 = arith.constant 0 : index
    %1 = vector.load %arg3[%c0_1, %c0_2] : memref<128x128xf32, #tpu.memory_space<vmem>>, vector<128x128xf32>
    %cst = arith.constant dense<0.000000e+00> : vector<8x128xf32>
    %2 = tpu.matmul %0, %1, %cst {dimension_numbers = #tpu.dot_dimension_numbers<[1], [0], [0], [1], [0, 0, 1, 1], [], []>} : vector<8x128xf32>, vector<128x128xf32>, vector<8x128xf32> -> vector<8x128xf32>
    %c0_3 = arith.constant 0 : index
    %c0_4 = arith.constant 0 : index
    %3 = vector.load %arg4[%c0_3, %c0_4] : memref<1x128xf32, #tpu.memory_space<vmem>>, vector<1x128xf32>
    %4 = vector.broadcast %3 : vector<1x128xf32> to vector<8x128xf32>
    %5 = arith.addf %2, %4 : vector<8x128xf32>
    %c0_5 = arith.constant 0 : index
    %c0_6 = arith.constant 0 : index
    %6 = vector.load %arg5[%c0_5, %c0_6] : memref<8x128xf32, #tpu.memory_space<vmem>>, vector<8x128xf32>
    %7 = arith.negf %5 : vector<8x128xf32>
    %8 = math.exp %7 : vector<8x128xf32>
    %cst_7 = arith.constant 1.000000e+00 : f32
    %9 = vector.broadcast %cst_7 : f32 to vector<8x128xf32>
    %10 = arith.addf %9, %8 : vector<8x128xf32>
    %11 = arith.divf %9, %10 : vector<8x128xf32>
    %12 = arith.mulf %5, %11 : vector<8x128xf32>
    %13 = arith.addf %6, %12 : vector<8x128xf32>
    %c0_8 = arith.constant 0 : index
    %c0_9 = arith.constant 0 : index
    %14 = vector.load %arg6[%c0_8, %c0_9] : memref<8x128xf32, #tpu.memory_space<vmem>>, vector<8x128xf32>
    tpu.vector_store %arg6[%c0_8, %c0_9], %13 {strides = array<i32>} : memref<8x128xf32, #tpu.memory_space<vmem>>, vector<8x128xf32>,
    return
  }
  func.func @transform_0(%arg0: i32, %arg1: i32) -> (i32, i32) {
    %c0_i32 = arith.constant 0 : i32
    %c0_i32_0 = arith.constant 0 : i32
    return %arg1, %c0_i32 : i32, i32
  }
  func.func @transform_1(%arg0: i32, %arg1: i32) -> (i32, i32) {
    %c0_i32 = arith.constant 0 : i32
    %c0_i32_0 = arith.constant 0 : i32
    return %c0_i32, %arg0 : i32, i32
  }
  func.func @transform_2(%arg0: i32, %arg1: i32) -> (i32, i32) {
    %c0_i32 = arith.constant 0 : i32
    %c0_i32_0 = arith.constant 0 : i32
    return %c0_i32, %arg0 : i32, i32
  }
  func.func @transform_3(%arg0: i32, %arg1: i32) -> (i32, i32) {
    %c0_i32 = arith.constant 0 : i32
    return %arg1, %arg0 : i32, i32
  }
  func.func @transform_4(%arg0: i32, %arg1: i32) -> (i32, i32) {
    %c0_i32 = arith.constant 0 : i32
    return %arg1, %arg0 : i32, i32
  }
}

</mosaic_0001>

<bundles_post_ra>
// kernel: tpu_custom_call.1
= control target key start
LH: loop header
LB: loop body
LE: loop exit
PB: predicated region body
PF: predicated region fallthrough
CT: control target
= control target key end

     0   :  { %9 = vsyncpa [#allocation3], 0  ;;  %s1115_s0 = inlined_call_operand.hbm [shape: f32[16,128], index: 0, kind: input, shape index: {}]   ;;  %s1116_s1 = inlined_call_operand.hbm [shape: f32[128,128], index: 1, kind: input, shape index: {}]   ;;  %s1117_s2 = inlined_call_operand.vmem [shape: f32[1,128], index: 2, kind: input, shape index: {}]   ;;  %s1118_s3 = inlined_call_operand.hbm [shape: f32[16,128], index: 3, kind: input, shape index: {}]   ;;  %s1119_s4 = inlined_call_operand.hbm [shape: f32[16,128], index: 4, kind: output, shape index: {}]  }
   0x1   :  { %11 = vsyncpa [#allocation3 + $0x1], 0 }
   0x2   :  { %12 = vsyncpa [#allocation6], 0 }
   0x3   :  { %13 = vsyncpa [#allocation4], 0 }
   0x4   :  { %15 = vsyncpa [#allocation4 + $0x1], 0  ;;  %s907_s15 = smov 0   ;;  %s909_s16 = smov 0  }
   0x5   :  { %s911_s17 = smov 0   ;;  %s913_s18 = smov 0  }
   0x6   :  { %s915_s19 = smov 0   ;;  %s917_s20 = smov 0  }
   0x7 LB: > { %s30_s21 = sadd.s32 1, %s868_s19  ;;  %s40_s22 = sadd.s32 1, %s860_s17  ;;  %s872_s20 = sphi %s917_s20, %s21_s20   ;;  %s868_s19 = sphi %s915_s19, %s1139_s19   ;;  %s864_s18 = sphi %s913_s18, %s1138_s18   ;;  %s860_s17 = sphi %s911_s17, %s1137_s17   ;;  %s856_s16 = sphi %s909_s16, %s1136_s16   ;;  %s852_s15 = sphi %s907_s15, %s1135_s15  }
   0x8   : > { %p31_p0 = scmp.ge.s32.totalorder %s30_s21, 2  ;;  %p47_p1 = scmp.ne.s32.totalorder %s860_s17, %s856_s16 }
   0x9   : > { %p48_p2 = scmp.eq.s32.totalorder %s872_s20, 0  ;;  %p642_p5 = scmp.lt.s32.totalorder %s872_s20, 2 }
   0xa   : > { %s1141_s21 = smov (%p31_p0, %s30_s21), 0  ;;  %s206_s24 = sand.u32 1, %s872_s20  }
   0xb   : > { %p49_p4 = por %p48_p2, %p47_p1  ;;  %s37_s23 = ssub.s32 %s868_s19, %s1141_s21 }
   0xc   : > { %p38_p6 = scmp.eq.s32.totalorder %s37_s23, 0  ;;  %s208_s25 = sand.u32 1, %s860_s17  }
   0xd   : > { %s550_s26 = sshll.u32 %s868_s19, 7  ;;  %s957_s28 = sshll.u32 %s208_s25, 3 }
   0xe   : > { %s955_s27 = scalar_select %p38_p6, %s860_s17, %s40_s22  }
   0xf   : > { %s215_s5 = scalar_lea.hbm %s1115_s0, %s550_s26  ;;  %p964_p7 = pnand %p642_p5, %p49_p4 }
  0x10   : > { %s210_s7 = scalar_lea.vmem [#allocation2], %s957_s28  ;;  %s969_s9 = scalar_lea.sflag [#allocation3], %s206_s24 }
  0x11   : > { %s217_s8 = sshll.u32 %s210_s7, 4  ;;  %p704_p8 = pneg %p964_p7  ;;  %s218_s8 = int_to_ptr.vmem [resolvable:$true] %s217_s8 }
  0x12   : > { %s715_s10 = scalar_lea.vmem %s218_s8, 128  ;;  %s874_s11 = smov [#allocation2]  }
  0x13   : > { %p716_p9 = scmp.ne.s32.totalorder %s218_s8, %s715_s10  ;;  %s720_s12 = sshll.u32 %s874_s11, 4  ;;  %s721_s12 = int_to_ptr.vmem [resolvable:$false] %s720_s12 }
  0x14   : > { %s722_s13 = scalar_lea.vmem %s721_s12, 256  ;;  %p723_p12 = scmp.lt.s32.totalorder %s218_s8, %s721_s12 }
  0x15   : > { %p718_p10 = pnand %p716_p9, %p704_p8  ;;  %p724_p13 = scmp.lt.s32.totalorder %s722_s13, %s715_s10 }
  0x17   : > { %p719_p11 = pneg %p718_p10  ;;  %p725_p0 = por %p724_p13, %p723_p12 }
  0x19   : > { %p726_p2 = pnand %p725_p0, %p719_p11 }
  0x1b   : > { %729 = shalt.err (!%p726_p2)
}
  0x1c   : > { %633 = dma.hbm_to_vmem [thread:$0]  (!%p964_p7), %s215_s5, 128, %s218_s8, %s969_s9  }
  0x1d   : > { %s980_s14 = sadd.s32 4294967295, %s872_s20   ;;  %s544_s22 = sadd.s32 4294967294, %s872_s20  }
  0x1e   : > { %p53_p4 = scmp.ne.s32.totalorder %s856_s16, %s852_s15  ;;  %p1121_p5 = scmp.eq.s32.totalorder %s980_s14, 0 }
  0x1f   : > { %p159_p6 = scmp.eq.s32.totalorder %s980_s14, 1  ;;  %p165_p9 = scmp.eq.s32.totalorder %s544_s22, 1 }
  0x20   : > { %p545_p10 = scmp.ge.s32.totalorder %s872_s20, 1  ;;  %p990_p11 = por %p1121_p5, %p53_p4 }
  0x21   : > { %p997_p12 = por %p159_p6, %p47_p1  ;;  %p1001_p13 = por %p165_p9, %p53_p4 }
  0x22   : > { %s1124_s23 = scalar_select %p990_p11, 1, 0 }
  0x23   : > { %s1125_s24 = scalar_select %p997_p12, 1, 0 }
  0x24   : > { %s1126_s25 = scalar_select %p1001_p13, 1, 0 }
  0x25   : > { %p172_p0 = scmp.lt.s32.totalorder %s872_s20, 3  ;;  %s875_s30 = smov [#allocation5]  }
  0x26   : > { %s186_s5 = sshll.u32 %s875_s30, 4  ;;  %s234_s10 = scalar_lea.hbm %s1118_s3, %s550_s26  ;;  %s1015_s5 = int_to_ptr.vmem [resolvable:$true] %s186_s5 }
  0x27   : > { %p1006_p2 = pnand %p545_p10, %p172_p0  ;;  %s228_s11 = scalar_lea.vmem [#allocation7], %s957_s28 }
  0x28   : > { %s236_s12 = sshll.u32 %s228_s11, 4  ;;  %s876_s30 = smov [#allocation7]   ;;  %s237_s12 = int_to_ptr.vmem [resolvable:$true] %s236_s12 }
  0x29   : > { %p626_p1 = pneg %p1006_p2  ;;  %s743_s22 = scalar_lea.vmem %s237_s12, 128 }
  0x2a   : > { %p744_p6 = scmp.ne.s32.totalorder %s237_s12, %s743_s22  ;;  %s748_s26 = sshll.u32 %s876_s30, 4  ;;  %s749_s26 = int_to_ptr.vmem [resolvable:$false] %s748_s26 }
  0x2b   : > { %p1022_p4 = pnand %p626_p1, %p1121_p5  ;;  %s750_s7 = scalar_lea.vmem %s749_s26, 256 }
  0x2c   : > { %p746_p9 = pnand %p744_p6, %p704_p8  ;;  %p751_p0 = scmp.lt.s32.totalorder %s237_s12, %s749_s26 }
  0x2d   : > { %p752_p3 = scmp.lt.s32.totalorder %s750_s7, %s743_s22 }
  0x2e   : > { %p747_p10 = pneg %p746_p9 }
  0x2f   : > { %p753_p13 = por %p752_p3, %p751_p0 }
  0x31   : > { %p754_p12 = pnand %p753_p13, %p747_p10 }
  0x33   : > { %757 = shalt.err (!%p754_p12)
}
  0x34   : > { %636 = dma.hbm_to_vmem [thread:$0]  (!%p964_p7), %s234_s10, 128, %s237_s12, %s969_s9  }
  0x35   : > { %p760_p8 = pneg %p1022_p4  ;;  %s769_s28 = scalar_lea.vmem %s1015_s5, 2048 }
  0x36   : > { %p770_p1 = scmp.ne.s32.totalorder %s1015_s5, %s769_s28  ;;  %p777_p5 = scmp.lt.s32.totalorder %s1015_s5, %s1015_s5 }
  0x37   : > { %p778_p11 = scmp.lt.s32.totalorder %s769_s28, %s769_s28 }
  0x38   : > { %p772_p6 = pnand %p770_p1, %p760_p8 }
  0x39   : > { %p779_p3 = por %p778_p11, %p777_p5 }
  0x3a   : > { %p773_p9 = pneg %p772_p6 }
  0x3c   : > { %p780_p13 = pnand %p779_p3, %p773_p9 }
  0x3e   : > { %783 = shalt.err (!%p780_p13)
}
  0x3f   : > { %s877_s8 = smov 128   ;;  %s878_s6 = smov 8  }
  0x40   : > { %629 = dma.hbm_to_vmem [thread:$0]  (!%p1022_p4), %s1116_s1, 2048, %s1015_s5, [#allocation6], %s877_s8, %s877_s8, %s878_s6  }
  0x41   : > { %245 = sbr.rel (%p1006_p2) target bundleno = 354 (0x162), region = 36  ;;  %s247_s9 = sand.u32 (!%p1006_p2), 1, %s980_s14  }
  0x42   : > { %s249_s10 = sand.u32 (!%p1006_p2), 1, %s856_s16   ;;  %s248_s30 = scalar_lea.sflag (!%p1006_p2), [#allocation3], %s247_s9 }
  0x43   : > { %s1050_s12 = sshll.u32 (!%p1006_p2), %s249_s10, 3  ;;  %p1129_p7 = scmp.ne.s32.totalorder (!%p1006_p2), %s1124_s23, 0 }
  0x44   : > { %s251_s26 = scalar_lea.vmem (!%p1006_p2), [#allocation2], %s1050_s12 }
  0x46   : > { %835 = dma.done.wait (%p1129_p7), %s248_s30, 128  }
  0x47   : > { %837 = vsyncadd (%p1129_p7), %s248_s30, 4294967168  ;;  %p1130_p5 = scmp.eq.s32.totalorder %s980_s14, 0 }
  0x49   : > { %839 = dma.done.wait (%p1130_p5), [#allocation6], 2048   ;;  %p1131_p11 = pmov %p1130_p5 }
  0x4a   : > { %s264_s29 = scalar_lea.vmem [#allocation7], %s1050_s12 }
  0x4b   : > { %841 = vsyncadd (%p1131_p11), [#allocation6], 4294965248 }
  0x4c   : > { %843 = dma.done.wait (%p1129_p7), %s248_s30, 128  }
  0x4d   : > { %845 = vsyncadd (%p1129_p7), %s248_s30, 4294967168  ;;  %v879_v0 = vmov 0.0   ;;  %vm880_vm0 = vmmov 0   ;;  %v316_v1 = vld [vmem:[#allocation5 + $0x78] sm:$0xff]  ;;  %v315_v2 = vld [vmem:[#allocation5 + $0x70] sm:$0xff]  ;;  %s561_s5 = sshll.u32 %s864_s18, 7 }
  0x4e   : > { %581 = vmatprep.subr.mxu0 %v879_v0  ;;  %613 = vmatprep.mubr.msk.f32.mxu0 %vm880_vm0, %v879_v0  ;;  %v314_v3 = vld [vmem:[#allocation5 + $0x68] sm:$0xff]  ;;  %v313_v4 = vld [vmem:[#allocation5 + $0x60] sm:$0xff]  ;;  %v312_v5 = vld [vmem:[#allocation5 + $0x58] sm:$0xff]  ;;  %s296_s13 = scalar_lea.vmem [#allocation8], %s1050_s12  ;;  %s417_s6 = scalar_lea.hbm %s1119_s4, %s561_s5 }
  0x4f   : > { %582 = vmatpush3.msra.mxu0 %v316_v1  ;;  %v311_v6 = vld [vmem:[#allocation5 + $0x50] sm:$0xff]  ;;  %v310_v7 = vld [vmem:[#allocation5 + $0x48] sm:$0xff]  ;;  %v309_v8 = vld [vmem:[#allocation5 + $0x40] sm:$0xff]  ;;  %s419_s7 = sshll.u32 %s296_s13, 4  ;;  %s405_s11 = scalar_lea.sflag [#allocation4], %s249_s10  ;;  %s420_s7 = int_to_ptr.vmem [resolvable:$true] %s419_s7 }
  0x50   : > { %583 = vmatprep.subr.mxu0 %v879_v0  ;;  %v308_v9 = vld [vmem:[#allocation5 + $0x38] sm:$0xff]  ;;  %v307_v10 = vld [vmem:[#allocation5 + $0x30] sm:$0xff]  ;;  %v306_v11 = vld [vmem:[#allocation5 + $0x28] sm:$0xff]  ;;  %s784_s22 = scalar_lea.vmem %s420_s7, 128  ;;  %p1132_p2 = scmp.ne.s32.totalorder %s1125_s24, 0 }
  0x51   : > { %584 = vmatpush3.msra.mxu0 %v315_v2  ;;  %v305_v12 = vld [vmem:[#allocation5 + $0x20] sm:$0xff]  ;;  %v304_v13 = vld [vmem:[#allocation5 + $0x18] sm:$0xff]  ;;  %v303_v14 = vld [vmem:[#allocation5 + $0x10] sm:$0xff]  ;;  %p785_p12 = scmp.ne.s32.totalorder %s420_s7, %s784_s22  ;;  %s881_s9 = smov [#allocation8]  }
  0x52   : > { %585 = vmatprep.subr.mxu0 %v879_v0  ;;  %v302_v15 = vld [vmem:[#allocation5 + $0x8] sm:$0xff]  ;;  %v301_v16 = vld [vmem:[#allocation5] sm:$0xff]  ;;  %v300_v17 = vld [vmem:[%s251_s26] sm:$0xff]  ;;  %s788_s30 = sshll.u32 %s881_s9, 4  ;;  %s789_s30 = int_to_ptr.vmem [resolvable:$false] %s788_s30 }
  0x53   : > { %586 = vmatpush3.msra.mxu0 %v314_v3  ;;  %v558_v18 = vld [vmem:[%s1117_s2] ss:$0 sm:$0xff]  ;;  %v394_v26 = vld [vmem:[%s264_s29] sm:$0xff]  ;;  %p786_p4 = pnand %p785_p12, %p1132_p2  ;;  %s790_s18 = scalar_lea.vmem %s789_s30, 256 }
  0x54   : > { %587 = vmatprep.subr.mxu0 %v879_v0  ;;  %p791_p0 = scmp.lt.s32.totalorder %s420_s7, %s789_s30  ;;  %p792_p8 = scmp.lt.s32.totalorder %s790_s18, %s784_s22 }
  0x55   : > { %588 = vmatpush3.msra.mxu0 %v313_v4  ;;  %p787_p10 = pneg %p786_p4 }
  0x56   : > { %589 = vmatprep.subr.mxu0 %v879_v0  ;;  %p793_p1 = por %p792_p8, %p791_p0 }
  0x57   : > { %590 = vmatpush3.msra.mxu0 %v312_v5 }
  0x58   : > { %591 = vmatprep.subr.mxu0 %v879_v0  ;;  %p794_p6 = pnand %p793_p1, %p787_p10 }
  0x59   : > { %592 = vmatpush3.msra.mxu0 %v311_v6 }
  0x5a   : > { %593 = vmatprep.subr.mxu0 %v879_v0 }
  0x5b   : > { %594 = vmatpush3.msra.mxu0 %v310_v7 }
  0x5c   : > { %595 = vmatprep.subr.mxu0 %v879_v0 }
  0x5d   : > { %596 = vmatpush3.msra.mxu0 %v309_v8 }
  0x5e   : > { %597 = vmatprep.subr.mxu0 %v879_v0 }
  0x5f   : > { %598 = vmatpush3.msra.mxu0 %v308_v9 }
  0x60   : > { %599 = vmatprep.subr.mxu0 %v879_v0 }
  0x61   : > { %600 = vmatpush3.msra.mxu0 %v307_v10 }
  0x62   : > { %601 = vmatprep.subr.mxu0 %v879_v0 }
  0x63   : > { %602 = vmatpush3.msra.mxu0 %v306_v11 }
  0x64   : > { %603 = vmatprep.subr.mxu0 %v879_v0 }
  0x65   : > { %604 = vmatpush3.msra.mxu0 %v305_v12 }
  0x66   : > { %605 = vmatprep.subr.mxu0 %v879_v0 }
  0x67   : > { %606 = vmatpush3.msra.mxu0 %v304_v13 }
  0x68   : > { %607 = vmatprep.subr.mxu0 %v879_v0 }
  0x69   : > { %608 = vmatpush3.msra.mxu0 %v303_v14 }
  0x6a   : > { %609 = vmatprep.subr.mxu0 %v879_v0 }
  0x6b   : > { %610 = vmatpush3.msra.mxu0 %v302_v15 }
  0x6c   : > { %611 = vmatprep.subr.mxu0 %v879_v0 }
  0x6d   : > { %612 = vmatpush3.msra.mxu0 %v301_v16 }
  0x6e   : > { %614 = vmatmul.mubr.f32.vlgmr.msra.gmra.mxu0 %v300_v17 }
 0x12e   : > { %v390_v19 = vpop.f32.mrf.mxu0 }
 0x12f   : > { %v391_v20 = vadd.f32 %v558_v18, %v390_v19 }
 0x130   : > { %v615_v21 = vpop.f32.mrf.mxu0 }
 0x131   : > { %v559_v22 = vmul.f32 -1.442695, %v391_v20 }
 0x133   : > { %698 = vpow2.f32 %v559_v22 }
 0x140   : > { %v699_v23 = vpop.eup %698 }
 0x141   : > { %v398_v24 = vadd.f32 1.0, %v699_v23 }
 0x143   : > { %700 = vrcp.f32 %v398_v24 }
 0x150   : > { %v701_v25 = vpop.eup %700 }
 0x151   : > { %v401_v27 = vmul.f32 %v701_v25, %v391_v20 }
 0x153   : > { %v402_v28 = vadd.f32 %v401_v27, %v394_v26 }
 0x155   : > { %403 = vst [vmem:[%s296_s13] sm:$0xff] %v402_v28 }
 0x156   : > { %797 = shalt.err (!%p794_p6)
}
 0x157   : > { %s798_s12 = scalar_lea.hbm %s417_s6, 128  ;;  %s802_s29 = scalar_lea.hbm %s1119_s4, 256 }
 0x158   : > { %p799_p9 = scmp.ne.s32.totalorder %s417_s6, %s798_s12  ;;  %p803_p7 = scmp.lt.s32.totalorder %s417_s6, %s1119_s4 }
 0x159   : > { %p804_p5 = scmp.lt.s32.totalorder %s802_s29, %s798_s12 }
 0x15a   : > { %p800_p3 = pnand %p799_p9, %p1132_p2 }
 0x15b   : > { %p805_p11 = por %p804_p5, %p803_p7 }
 0x15c   : > { %p801_p13 = pneg %p800_p3 }
 0x15e   : > { %p806_p12 = pnand %p805_p11, %p801_p13 }
 0x160   : > { %809 = shalt.err (!%p806_p12)
}
 0x161   : > { %624 = dma.vmem_to_hbm [thread:$0]  (%p1132_p2), %s420_s7, 128, %s417_s6, %s405_s11  }
 0x162 PF: > { %s431_s5 = sand.u32 1, %s852_s15   ;;  %p1133_p4 = scmp.ne.s32.totalorder %s1126_s25, 0 }
 0x163   : > { %p1134_p10 = scmp.ge.s32.totalorder %s872_s20, 2  ;;  %s432_s13 = scalar_lea.sflag [#allocation4], %s431_s5 }
 0x165   : > { %p638_p0 = pnand %p1134_p10, %p1133_p4 }
 0x167   : > { %p639_p8 = pneg %p638_p0 }
 0x169   : > { %847 = dma.done.wait (%p639_p8), %s432_s13, 128  }
 0x16a   : > { %849 = vsyncadd (%p639_p8), %s432_s13, 4294967168  ;;  %s21_s20 = sadd.s32 1, %s872_s20   ;;  %s1135_s15 = smov %s856_s16 }
 0x16b   : > { %p18_p1 = scmp.ge.s32.totalorder %s21_s20, 4   ;;  %s1136_s16 = smov %s860_s17 }
 0x16c   : > { %s1137_s17 = smov %s955_s27  ;;  %s1138_s18 = smov %s868_s19 }
 0x16d   : > { %s1139_s19 = smov %s1141_s21  ;;  %20 = sbr.rel (!%p18_p1) target bundleno = 7 (0x7), region = 100 }
 0x172   :  { %437 = vsyncpa [#allocation3], 1 }
 0x173   :  { %439 = vsyncpa [#allocation3 + $0x1], 1 }
 0x174   :  { %440 = vsyncpa [#allocation6], 1 }
 0x175   :  { %441 = vsyncpa [#allocation4], 1 }
 0x176   :  { %443 = vsyncpa [#allocation4 + $0x1], 1 }

</bundles_post_ra>
